<compile_context>
chip_gen: v6e
topology: v6e:2x2x1
jax: 0.10.0
libtpu: 0.0.40
codegen_flags: <defaults>
</compile_context>

<pallas_src>
import functools

import jax
import jax.numpy as jnp
from jax.experimental import pallas as pl
from jax.experimental.pallas import tpu as pltpu

_LANES = 128


def _round_down(n: int, m: int) -> int:
    return n // m * m


def _tpu_generation() -> int:
    """Best-effort TPU generation probe; falls back to conservative sizing."""
    try:
        kind = jax.devices()[0].device_kind.lower()
    except Exception:  # pragma: no cover - defensive
        kind = ""
    if "v7" in kind or "7x" in kind:
        return 7
    if "v6" in kind or "6e" in kind:
        return 6
    return 5  # v5e / unknown -> most conservative


def _ppower_kernel(lamda_ref, x_ref, o_ref, *, compute_dtype):
    # lamda_ref: SMEM prefetch scalar (1,), x_ref/o_ref: VMEM (tile_rows, 128).
    lam = lamda_ref[0].astype(compute_dtype)
    x = x_ref[...].astype(compute_dtype)
    pos = x > 0
    one = jnp.asarray(1, compute_dtype)
    zero = jnp.asarray(0, compute_dtype)
    safe = jnp.where(pos, x, one)                 # keep pow defined on dead lanes
    out = jnp.where(pos, jnp.power(safe, lam), zero)
    o_ref[...] = out.astype(o_ref.dtype)


def ppower(x: jax.Array, lamda: jax.Array) -> jax.Array:
    """Apply PPower elementwise. x: any shape, lamda: shape (1,)."""
    orig_shape = x.shape
    dtype = x.dtype
    itemsize = jnp.dtype(dtype).itemsize
    sublane = max(8, 32 // itemsize)              # 8 for f32, 16 for bf16
    align = _LANES * sublane

    gen = _tpu_generation()
    # Bytes per live buffer; 4 live buffers (in + out, double-buffered).
    if gen >= 7:
        target_buf_bytes, vmem_limit, n_cores = 4 << 20, 48 << 20, 2
    elif gen == 6:
        target_buf_bytes, vmem_limit, n_cores = 4 << 20, 48 << 20, 1
    else:  # v5e / unknown: stay within the 16 MiB default scoped VMEM
        target_buf_bytes, vmem_limit, n_cores = 2 << 20, None, 1

    # bf16 EUP/VPU exist on v6e/v7x; v5e must compute in f32.
    if dtype == jnp.bfloat16 and gen >= 6:
        compute_dtype = jnp.bfloat16
    else:
        compute_dtype = jnp.float32

    lam_f32 = lamda.astype(jnp.float32)
    flat = x.reshape(-1)
    total = flat.size
    aligned = _round_down(total, align)

    def _tail_ref(v):
        # Tiny (< sublane*128 elements) leftover handled in plain JAX.
        vf = v.astype(jnp.float32)
        pos = vf > 0.0
        out = jnp.where(pos, jnp.power(jnp.where(pos, vf, 1.0), lam_f32[0]), 0.0)
        return out.astype(dtype)

    if aligned == 0:
        return _tail_ref(flat).reshape(orig_shape)

    rows = aligned // _LANES
    x2d = flat[:aligned].reshape(rows, _LANES)    # no-op slice when shapes divide

    max_tile_rows = max(
        sublane, _round_down(target_buf_bytes // (_LANES * itemsize), sublane)
    )
    tile_rows = min(max_tile_rows, rows)
    if n_cores >= 2 and rows >= 2 * sublane:
        # Guarantee >= 2 grid steps so both v7x TensorCores get work.
        half = max(sublane, _round_down(rows // 2, sublane))
        tile_rows = min(tile_rows, half)

    grid = (pl.cdiv(rows, tile_rows),)

    n_elem = rows * _LANES
    cost = pl.CostEstimate(
        flops=4 * n_elem,                         # cmp + selects + mul inside pow
        transcendentals=2 * n_elem,               # runtime-exponent pow = log + exp
        bytes_accessed=2 * n_elem * itemsize,
    )

    out2d = pl.pallas_call(
        functools.partial(_ppower_kernel, compute_dtype=compute_dtype),
        out_shape=jax.ShapeDtypeStruct((rows, _LANES), dtype),
        grid_spec=pltpu.PrefetchScalarGridSpec(
            num_scalar_prefetch=1,                # lamda -> SMEM before the grid runs
            grid=grid,
            in_specs=[pl.BlockSpec((tile_rows, _LANES), lambda i, lam: (i, 0))],
            out_specs=pl.BlockSpec((tile_rows, _LANES), lambda i, lam: (i, 0)),
        ),
        compiler_params=pltpu.CompilerParams(
            dimension_semantics=("parallel",),
            vmem_limit_bytes=vmem_limit,
        ),
        cost_estimate=cost,
    )(lam_f32, x2d)

    if aligned == total:
        return out2d.reshape(orig_shape)
    tail_out = _tail_ref(flat[aligned:])
    return jnp.concatenate([out2d.reshape(-1), tail_out]).reshape(orig_shape)


if __name__ == "__main__":
    key = jax.random.PRNGKey(0)
    k_x, k_lam = jax.random.split(key)

    # Deterministic parameter init mirroring torch.Tensor(1).normal_(1.0, 0.1)
    lamda = 1.0 + 0.1 * jax.random.normal(k_lam, (1,), dtype=jnp.float32)

    # Small NCHW input consistent with a typical conv feature map.
    x = jax.random.normal(k_x, (2, 4, 16, 16), dtype=jnp.float32)

    out = ppower(x, lamda)
    jax.block_until_ready(out)

    # Reference check in plain JAX (original mask-based formulation).
    mask = (x > 0.0).astype(x.dtype)
    inv_mask = 1.0 - mask
    ref = jnp.power(x * mask + inv_mask, lamda[0]) - inv_mask
    assert out.shape == x.shape and out.dtype == x.dtype
    assert jnp.allclose(out, ref, atol=1e-5, rtol=1e-5), "mismatch vs reference"

    print("KERNEL_OK")
</pallas_src>

<mosaic_0001>
module attributes {stable_mosaic.version = 11 : i64} {
  func.func @_ppower_kernel(%arg0: i32, %arg1: memref<1xf32, #tpu.memory_space<smem>>, %arg2: memref<16x128xf32, #tpu.memory_space<vmem>>, %arg3: memref<16x128xf32, #tpu.memory_space<vmem>>) attributes {dimension_semantics = [#tpu.dimension_semantics<parallel>], iteration_bounds = array<i64: 1>, scalar_prefetch = 1 : i64, scratch_operands = 0 : i64, tpu.core_type = #tpu.core_type<tc>, window_params = [{transform_indices = @transform_0, window_bounds = array<i64: 16, 128>}, {transform_indices = @transform_1, window_bounds = array<i64: 16, 128>}]} {
    %c0 = arith.constant 0 : index
    %0 = memref.load %arg1[%c0] : memref<1xf32, #tpu.memory_space<smem>>
    %c0_0 = arith.constant 0 : index
    %c0_1 = arith.constant 0 : index
    %1 = vector.load %arg2[%c0_0, %c0_1] : memref<16x128xf32, #tpu.memory_space<vmem>>, vector<16x128xf32>
    %cst = arith.constant 0.000000e+00 : f32
    %2 = vector.broadcast %cst : f32 to vector<16x128xf32>
    %3 = arith.cmpf ogt, %1, %2 : vector<16x128xf32>
    %cst_2 = arith.constant 1.000000e+00 : f32
    %4 = vector.broadcast %cst_2 : f32 to vector<16x128xf32>
    %5 = arith.select %3, %1, %4 : vector<16x128xi1>, vector<16x128xf32>
    %6 = vector.broadcast %0 : f32 to vector<16x128xf32>
    %7 = math.powf %5, %6 : vector<16x128xf32>
    %cst_3 = arith.constant 0.000000e+00 : f32
    %8 = vector.broadcast %cst_3 : f32 to vector<16x128xf32>
    %9 = arith.select %3, %7, %8 : vector<16x128xi1>, vector<16x128xf32>
    %c0_4 = arith.constant 0 : index
    %c0_5 = arith.constant 0 : index
    %10 = vector.load %arg3[%c0_4, %c0_5] : memref<16x128xf32, #tpu.memory_space<vmem>>, vector<16x128xf32>
    tpu.vector_store %arg3[%c0_4, %c0_5], %9 {strides = array<i32>} : memref<16x128xf32, #tpu.memory_space<vmem>>, vector<16x128xf32>,
    return
  }
  func.func @transform_0(%arg0: i32, %arg1: memref<1xf32, #tpu.memory_space<smem>>) -> (i32, i32) {
    %c0_i32 = arith.constant 0 : i32
    %c0_i32_0 = arith.constant 0 : i32
    return %arg0, %c0_i32 : i32, i32
  }
  func.func @transform_1(%arg0: i32, %arg1: memref<1xf32, #tpu.memory_space<smem>>) -> (i32, i32) {
    %c0_i32 = arith.constant 0 : i32
    %c0_i32_0 = arith.constant 0 : i32
    return %arg0, %c0_i32 : i32, i32
  }
}

</mosaic_0001>

<bundles_post_ra>
// kernel: tpu_custom_call.1
= control target key start
LH: loop header
LB: loop body
LE: loop exit
PB: predicated region body
PF: predicated region fallthrough
CT: control target
= control target key end

     0   :  { %8 = vsyncpa [#allocation5], 0  ;;  %s434_s0 = inlined_call_operand.<no memory space> [shape: f32[1], index: 0, kind: input, shape index: {}]   ;;  %s435_s1 = inlined_call_operand.hbm [shape: f32[16,128], index: 1, kind: input, shape index: {}]   ;;  %s436_s2 = inlined_call_operand.hbm [shape: f32[16,128], index: 2, kind: output, shape index: {}]  }
   0x1   :  { %9 = vsyncpa [#allocation6], 0  ;;  %s218_s9 = smov [#allocation4]  }
   0x2   :  { %s15_s10 = sshll.u32 %s218_s9, 4  ;;  %s16_s10 = int_to_ptr.vmem [resolvable:$true] %s15_s10 }
   0x3   :  { %s182_s11 = scalar_lea.vmem %s16_s10, 256  ;;  %p187_p1 = scmp.lt.s32.totalorder %s16_s10, %s16_s10 }
   0x4   :  { %p183_p0 = scmp.ne.s32.totalorder %s16_s10, %s182_s11  ;;  %p188_p2 = scmp.lt.s32.totalorder %s182_s11, %s182_s11 }
   0x6   :  { %p189_p3 = por %p188_p2, %p187_p1 }
   0x8   :  { %p190_p4 = pnand %p189_p3, %p183_p0 }
   0xa   :  { %193 = shalt.err (!%p190_p4)
}
   0xb   :  { %s219_s12 = smov 128   ;;  %s220_s13 = smov 8  }
   0xc   :  { %21 = dma.hbm_to_vmem [thread:$0]  %s435_s1, 256, %s16_s10, [#allocation5], %s219_s12, %s219_s12, %s220_s13  }
   0xd   :  { %214 = dma.done.wait [#allocation5], 256  }
   0xe   :  { %215 = vsyncadd [#allocation5], 4294967040  ;;  %v245_v0 = vld [vmem:[#allocation4] sm:$0xff]  ;;  %v247_v1 = vld [vmem:[#allocation4 + $0x8] sm:$0xff]  ;;  %v259_v3 = vstv %s434_s0  ;;  %v221_v20 = vmov 2139095040   ;;  %v222_v26 = vmov 0  }
   0xf   :  { %vm438_vm0 = vcmp.gt.f32.partialorder %v245_v0, 0.0  ;;  %vm437_vm1 = vcmp.gt.f32.partialorder %v247_v1, 0.0  ;;  %v270_v6 = vand.u32 2147483647, %v259_v3  ;;  %v65_v9 = vtrunc.f32 %v259_v3  ;;  %s223_s0 = smov [#allocation7]  }
  0x10   :  { %v254_v2 = vsel %vm438_vm0, %v245_v0, 1.0  ;;  %v264_v4 = vsel %vm437_vm1, %v247_v1, 1.0  ;;  %vm64_vm9 = vcmp.lt.f32.partialorder %v259_v3, 0  ;;  %vm62_vm0 = vcmp.eq.f32.partialorder %v259_v3, 0  ;;  %s44_s1 = sshll.u32 %s223_s0, 4  ;;  %s45_s1 = int_to_ptr.vmem [resolvable:$true] %s44_s1 }
  0x11   :  { %v267_v5 = vand.u32 2147483647, %v254_v2  ;;  %v273_v7 = vand.u32 2147483647, %v264_v4  ;;  %v69_v8 = vtrunc.f32 %v270_v6  ;;  %vm439_vm2 = vcmp.eq.f32.partialorder %v270_v6, 2139095040  ;;  %s194_s18 = scalar_lea.vmem %s45_s1, 256  ;;  %p199_p6 = scmp.lt.s32.totalorder %s45_s1, %s45_s1 }
  0x12   :  { %vm66_vm3 = vcmp.ne.f32.partialorder %v259_v3, %v65_v9  ;;  %vm68_vm7 = vcmp.lt.f32.partialorder %v270_v6, 1266679808  ;;  %vm77_vm10 = vcmp.eq.f32.partialorder %v254_v2, 0  ;;  %vm129_vm13 = vcmp.eq.f32.partialorder %v264_v4, 0  ;;  %p195_p5 = scmp.ne.s32.totalorder %s45_s1, %s194_s18  ;;  %p200_p7 = scmp.lt.s32.totalorder %s194_s18, %s194_s18 }
  0x13   :  { %166 = vlog2.f32 %v267_v5  ;;  %v70_v10 = vcvt.f32.s32 %v69_v8  ;;  %vm283_vm4 = vmor %vm66_vm3, %vm439_vm2  ;;  %vm80_vm11 = vcmp.gt.f32.partialorder %v267_v5, 1065353216  ;;  %vm132_vm15 = vcmp.gt.f32.partialorder %v273_v7, 1065353216 }
  0x14   :  { %168 = vlog2.f32 %v273_v7  ;;  %vm73_vm6 = vmneg %vm283_vm4  ;;  %vm440_vm3 = vcmp.lt.f32.partialorder %v254_v2, 0  ;;  %v96_v21 = vsel %vm64_vm9, 0, %v221_v20  ;;  %vm79_vm2 = vcmp.lt.s32.totalorder %v254_v2, 0  ;;  %p201_p8 = por %p200_p7, %p199_p6 }
  0x15   :  { %v71_v11 = vand.u32 1, %v70_v10  ;;  %vm304_vm14 = vmand %vm64_vm9, %vm77_vm10  ;;  %v97_v25 = vxor.u32 2147483648, %v96_v21  ;;  %v84_v27 = vsel %vm64_vm9, 2139095040, %v222_v26 }
  0x16   :  { %p202_p9 = pnand %p201_p8, %p195_p5 }
  0x17   :  { %vm72_vm5 = vcmp.eq.s32.totalorder %v71_v11, 1 }
  0x18   :  { %vm74_vm8 = vmand %vm72_vm5, %vm73_vm6 }
  0x19   :  { %vm295_vm12 = vmand %vm68_vm7, %vm74_vm8 }
  0x1a   :  { %vm312_vm5 = vmxor %vm64_vm9, %vm80_vm11  ;;  %vm441_vm11 = vcmp.lt.f32.partialorder %v264_v4, 0  ;;  %v98_v33 = vsel %vm295_vm12, %v97_v25, %v96_v21 }
  0x1b   :  { %vm322_vm6 = vmand %vm64_vm9, %vm129_vm13 }
  0x1c   :  { %vm328_vm7 = vmxor %vm64_vm9, %vm132_vm15  ;;  %vm131_vm9 = vcmp.lt.s32.totalorder %v264_v4, 0 }
  0x1d   :  { %vm336_vm8 = vmand %vm440_vm3, %vm283_vm4  ;;  %vm102_vm3 = vcmp.ne.f32.partialorder %v259_v3, %v259_v3 }
  0x1e   :  { %vm91_vm1 = vmor %vm304_vm14, %vm312_vm5  ;;  %vm93_vm5 = vcmp.eq.f32.partialorder %v254_v2, 3212836864 }
  0x1f   :  { %vm143_vm15 = vmor %vm322_vm6, %vm328_vm7  ;;  %v92_v30 = vsel %vm91_vm1, 2139095040, %v222_v26  ;;  %vm101_vm6 = vcmp.ne.f32.partialorder %v254_v2, %v254_v2  ;;  %vm78_vm7 = vcmp.eq.f32.partialorder %v254_v2, 1065353216  ;;  %vm81_vm1 = vcmp.eq.f32.partialorder %v267_v5, 2139095040 }
  0x20   :  { %v167_v13 = vpop.eup %166  ;;  %vm359_vm14 = vmand %vm441_vm11, %vm283_vm4  ;;  %v144_v34 = vsel %vm143_vm15, 2139095040, %v222_v26  ;;  %vm145_vm4 = vcmp.eq.f32.partialorder %v264_v4, 3212836864  ;;  %v94_v38 = vsel %vm93_vm5, 1065353216, %v92_v30  ;;  %vm153_vm15 = vcmp.ne.f32.partialorder %v264_v4, %v264_v4 }
  0x21   :  { %v169_v14 = vpop.eup %168  ;;  %v58_v15 = vmul.f32 %v167_v13, %v259_v3  ;;  %vm86_vm11 = vmand %vm79_vm2, %vm295_vm12  ;;  %v146_v43 = vsel %vm145_vm4, 1065353216, %v144_v34  ;;  %vm461_vm5 = vcmp.lt.f32.partialorder %v264_v4, 0 }
  0x22   :  { %v110_v16 = vmul.f32 %v169_v14, %v259_v3  ;;  %vm396_vm2 = vmor %vm101_vm6, %vm102_vm3  ;;  %v151_v45 = vsel %vm461_vm5, %v98_v33, %v96_v21  ;;  %vm462_vm6 = vcmp.eq.f32.partialorder %v270_v6, 2139095040 }
  0x23   :  { %170 = vpow2.f32 %v58_v15  ;;  %vm463_vm4 = vmmov %vm462_vm6 }
  0x24   :  { %172 = vpow2.f32 %v110_v16 }
  0x30   :  { %v171_v29 = vpop.eup %170 }
  0x31   :  { %v173_v31 = vpop.eup %172  ;;  %v83_v32 = vsel %vm336_vm8, 2143289344, %v171_v29  ;;  %vm138_vm8 = vmand %vm131_vm9, %vm295_vm12 }
  0x32   :  { %v85_v35 = vsel %vm77_vm10, %v84_v27, %v83_v32  ;;  %v135_v36 = vsel %vm359_vm14, 2143289344, %v173_v31  ;;  %vm458_vm10 = vcmp.lt.f32.partialorder %v254_v2, 0  ;;  %vm105_vm12 = vmor %vm78_vm7, %vm62_vm0  ;;  %vm133_vm14 = vcmp.eq.f32.partialorder %v273_v7, 2139095040 }
  0x33   :  { %v87_v37 = vxor.u32 2147483648, %v85_v35  ;;  %v137_v39 = vsel %vm129_vm13, %v84_v27, %v135_v36  ;;  %v99_v40 = vsel %vm458_vm10, %v98_v33, %v96_v21  ;;  %vm130_vm13 = vcmp.eq.f32.partialorder %v264_v4, 1065353216  ;;  %vm155_vm9 = vmor %vm153_vm15, %vm102_vm3 }
  0x34   :  { %v139_v42 = vxor.u32 2147483648, %v137_v39  ;;  %vm157_vm7 = vmor %vm130_vm13, %vm62_vm0  ;;  %vm464_vm3 = vcmp.gt.f32.partialorder %v245_v0, 0.0  ;;  %vm465_vm0 = vcmp.gt.f32.partialorder %v247_v1, 0.0 }
  0x35   :  { %v88_v44 = vsel %vm86_vm11, %v87_v37, %v85_v35  ;;  %vm63_vm11 = vcmp.eq.f32.partialorder %v259_v3, 1065353216 }
  0x36   :  { %v95_v46 = vsel %vm462_vm6, %v94_v38, %v88_v44  ;;  %v140_v47 = vsel %vm138_vm8, %v139_v42, %v137_v39 }
  0x37   :  { %v100_v48 = vsel %vm81_vm1, %v99_v40, %v95_v46  ;;  %v147_v49 = vsel %vm463_vm4, %v146_v43, %v140_v47 }
  0x38   :  { %v104_v50 = vsel %vm396_vm2, 2143289344, %v100_v48  ;;  %v152_v51 = vsel %vm133_vm14, %v151_v45, %v147_v49 }
  0x39   :  { %v106_v52 = vsel %vm105_vm12, 1065353216, %v104_v50  ;;  %v156_v53 = vsel %vm155_vm9, 2143289344, %v152_v51 }
  0x3a   :  { %v107_v54 = vsel %vm63_vm11, %v254_v2, %v106_v52  ;;  %v158_v55 = vsel %vm157_vm7, 1065353216, %v156_v53 }
  0x3b   :  { %v35_v56 = vsel %vm464_vm3, %v107_v54, 0.0  ;;  %v159_v57 = vsel %vm63_vm11, %v264_v4, %v158_v55 }
  0x3c   :  { %37 = vst [vmem:[#allocation7] sm:$0xff] %v35_v56  ;;  %v36_v58 = vsel %vm465_vm0, %v159_v57, 0.0 }
  0x3d   :  { %38 = vst [vmem:[#allocation7 + $0x8] sm:$0xff] %v36_v58 }
  0x3e   :  { %205 = shalt.err (!%p202_p9)
}
  0x3f   :  { %50 = dma.vmem_to_hbm [thread:$0]  %s45_s1, 256, %s436_s2, [#allocation6], %s219_s12, %s219_s12, %s220_s13  }
  0x40   :  { %216 = dma.done.wait [#allocation6], 256  }
  0x41   :  { %217 = vsyncadd [#allocation6], 4294967040 }
  0x42   :  { %54 = vsyncpa [#allocation5], 1 }
  0x43   :  { %55 = vsyncpa [#allocation6], 1 }

</bundles_post_ra>
